<compile_context>
chip_gen: v5e
topology: v5e:2x2
jax: 0.10.0
libtpu: 0.0.40
codegen_flags: <defaults>
</compile_context>

<pallas_src>
import jax
import jax.numpy as jnp
from jax.experimental import pallas as pl
from jax.experimental.pallas import tpu as pltpu

FOCAL_ALPHA = 0.25
NUM_CLASSES = 3

# src_pack row layout
_S_BOX = slice(0, 6)
_S_DEPTH = slice(6, 8)
_S_DIM = slice(8, 11)
_S_ANGLE = slice(11, 35)
F_SRC = 35
# tgt_pack row layout
_T_BOX = slice(0, 6)
_T_DEPTH = slice(6, 7)
_T_DIM = slice(7, 10)
_T_HCLS = slice(10, 11)
_T_HRES = slice(11, 12)
F_TGT = 12


# --------------------------------------------------------------------------- kernel
def _criterion_kernel(n_ref, logits_ref, tcls_ref, src_ref, tgt_ref, out_ref):
    """Fused per-layer loss sums: focal + cardinality + all matched-pair losses."""
    # ---------------- classification: sigmoid focal + cardinality -----------------
    x = logits_ref[...].astype(jnp.float32)                  # (B, C, Q)  Q on lanes
    B, C, Q = x.shape
    tcls = tcls_ref[...]                                      # (B, Q) int32  (same all layers)

    cls_iota = jax.lax.broadcasted_iota(jnp.int32, (B, C, Q), 1)
    t = (cls_iota == tcls[:, None, :]).astype(jnp.float32)    # in-kernel one-hot (bg row -> all 0)

    ax = jnp.abs(x)
    e = jnp.exp(-ax)                                          # single EUP exp reused below
    inv = 1.0 / (1.0 + e)
    prob = jnp.where(x >= 0.0, inv, e * inv)                  # sigmoid(x)
    ce = jnp.maximum(x, 0.0) - x * t + jnp.log(1.0 + e)       # stable BCE-with-logits
    p_t = prob * t + (1.0 - prob) * (1.0 - t)
    alpha_t = FOCAL_ALPHA * t + (1.0 - FOCAL_ALPHA) * (1.0 - t)
    focal_sum = jnp.sum(alpha_t * ce * (1.0 - p_t) ** 2)      # gamma = 2

    # cardinality: argmax over classes != C-1   <=>   max over fg classes >= bg logit
    if C > 1:
        fg_max = jnp.max(x[:, :C - 1, :], axis=1)             # (B, Q) sublane reduce
        nonbg = (fg_max >= x[:, C - 1, :]).astype(jnp.float32)
    else:
        nonbg = jnp.zeros((B, Q), jnp.float32)
    card = jnp.sum(nonbg, axis=1, keepdims=True)              # (B, 1)

    # ---------------- matched-pair losses (feature-major, pairs on lanes) ----------
    n = n_ref[0]
    src = src_ref[...]                                        # (35, Np)
    tgt = tgt_ref[...]                                        # (12, Np)
    Np = src.shape[1]
    mask = (jax.lax.broadcasted_iota(jnp.int32, (1, Np), 1) < n).astype(jnp.float32)
    mvalid = mask > 0.0

    sb = src[_S_BOX, :]                                       # (6, Np) [cx, cy, l, r, t, b]
    tb = tgt[_T_BOX, :]
    center_sum = jnp.sum(jnp.abs(sb[0:2, :] - tb[0:2, :]) * mask)
    bbox_sum = jnp.sum(jnp.abs(sb[2:6, :] - tb[2:6, :]) * mask)

    # GIoU on cxcylrtb -> xyxy
    sx1 = sb[0:1] - sb[2:3]; sy1 = sb[1:2] - sb[4:5]
    sx2 = sb[0:1] + sb[3:4]; sy2 = sb[1:2] + sb[5:6]
    tx1 = tb[0:1] - tb[2:3]; ty1 = tb[1:2] - tb[4:5]
    tx2 = tb[0:1] + tb[3:4]; ty2 = tb[1:2] + tb[5:6]
    area_s = (sx2 - sx1) * (sy2 - sy1)
    area_t = (tx2 - tx1) * (ty2 - ty1)
    iw = jnp.maximum(jnp.minimum(sx2, tx2) - jnp.maximum(sx1, tx1), 0.0)
    ih = jnp.maximum(jnp.minimum(sy2, ty2) - jnp.maximum(sy1, ty1), 0.0)
    inter = iw * ih
    union = area_s + area_t - inter
    ew = jnp.maximum(sx2, tx2) - jnp.minimum(sx1, tx1)
    eh = jnp.maximum(sy2, ty2) - jnp.minimum(sy1, ty1)
    encl = ew * eh
    union_safe = jnp.where(mvalid, union, 1.0)                # guard pad rows BEFORE the divide
    encl_safe = jnp.where(mvalid, encl, 1.0)
    iou = inter / union_safe
    giou = iou - (encl_safe - union_safe) / encl_safe
    giou_sum = jnp.sum((1.0 - giou) * mask)

    # depths (Laplacian aleatoric uncertainty)
    sd = src[_S_DEPTH, :]                                     # (2, Np) [depth, log_var]
    td = tgt[_T_DEPTH, :]                                     # (1, Np)
    dep = 1.4142 * jnp.exp(-sd[1:2, :]) * jnp.abs(sd[0:1, :] - td) + sd[1:2, :]
    depth_sum = jnp.sum(dep * mask)

    # dims: compensation_weight * relative_l1_sum == absolute_l1_sum  (exact identity)
    dim_sum = jnp.sum(jnp.abs(src[_S_DIM, :] - tgt[_T_DIM, :]) * mask)

    # angles: 12-way heading CE + residual L1 on the selected bin
    ang = src[_S_ANGLE, :]                                    # (24, Np)
    hcls = tgt[_T_HCLS, :].astype(jnp.int32)                  # (1, Np)
    bin_iota = jax.lax.broadcasted_iota(jnp.int32, (12, Np), 0)
    oh = (bin_iota == hcls).astype(jnp.float32)               # in-kernel one-hot (12, Np)
    logits12 = ang[0:12, :]
    mx = jnp.max(logits12, axis=0, keepdims=True)
    lse = mx + jnp.log(jnp.sum(jnp.exp(logits12 - mx), axis=0, keepdims=True))
    picked = jnp.sum(logits12 * oh, axis=0, keepdims=True)
    res_pred = jnp.sum(ang[12:24, :] * oh, axis=0, keepdims=True)
    reg = jnp.abs(res_pred - tgt[_T_HRES, :])
    angle_sum = jnp.sum((lse - picked + reg) * mask)

    # ---------------- pack every scalar into ONE unmasked lane-dense store ---------
    ROWS = out_ref.shape[0]
    scalars = [focal_sum, center_sum, bbox_sum, giou_sum, depth_sum, dim_sum, angle_sum]
    pieces = [jnp.reshape(s, (1, 1)) for s in scalars] + [card]       # (7,1)+(B,1)
    pad_rows = ROWS - len(scalars) - B
    if pad_rows > 0:
        pieces.append(jnp.zeros((pad_rows, 1), jnp.float32))
    vals = jnp.concatenate(pieces, axis=0)                            # (ROWS, 1)
    out_ref[...] = jnp.broadcast_to(vals, (ROWS, 128))                # single full-tile vst


# --------------------------------------------------------------------------- wrapper
class SetCriterionPallas:
    """JAX/Pallas re-implementation of MonoDETR SetCriterion.forward (eval semantics)."""

    def __init__(self, num_classes, focal_alpha, applied_losses, group_num=11):
        self.num_classes = num_classes
        self.focal_alpha = focal_alpha
        self.applied_losses = list(applied_losses)
        self.group_num = group_num
        self.training = False  # eval semantics -> group_num = 1

    def __call__(self, outputs, targets):
        group_num = self.group_num if self.training else 1
        sizes = [int(t['labels'].shape[0]) for t in targets]
        N = int(sum(sizes))
        num_boxes = float(max(N * group_num, 1))

        aux = list(outputs.get('aux_outputs', []))
        heads = [outputs] + aux
        L = len(heads)

        logits0 = outputs['pred_logits']
        B, Q, C = logits0.shape

        # -------- identity matching (TODO(synk): Hungarian matcher) --------
        batch_idx = jnp.concatenate(
            [jnp.full((n,), i, jnp.int32) for i, n in enumerate(sizes)], axis=0)
        src_idx = jnp.concatenate(
            [jnp.arange(n, dtype=jnp.int32) for n in sizes], axis=0)
        labels_o = jnp.concatenate(
            [t['labels'] for t in targets], axis=0).reshape(-1).astype(jnp.int32)

        # -------- stack all heads along a leading L axis (one gridded launch) --------
        logits = jnp.stack([h['pred_logits'] for h in heads], 0).astype(jnp.float32)   # (L,B,Q,C)
        logits_t = jnp.transpose(logits, (0, 1, 3, 2))                                 # (L,B,C,Q)
        boxes = jnp.stack([h['pred_boxes'] for h in heads], 0).astype(jnp.float32)     # (L,B,Q,6)
        depth = jnp.stack([h['pred_depth'] for h in heads], 0).astype(jnp.float32)     # (L,B,Q,2)
        dim3d = jnp.stack([h['pred_3d_dim'] for h in heads], 0).astype(jnp.float32)    # (L,B,Q,3)
        angle = jnp.stack([h['pred_angle'] for h in heads], 0).astype(jnp.float32)     # (L,B,Q,24)

        # matched-pair gather (same indices for every head under identity matching)
        src_box = boxes[:, batch_idx, src_idx, :]                                      # (L,N,6)
        src_depth = depth[:, batch_idx, src_idx, :]                                    # (L,N,2)
        src_dim = dim3d[:, batch_idx, src_idx, :]                                      # (L,N,3)
        src_angle = angle[:, batch_idx, src_idx, :]                                    # (L,N,24)
        src_pack = jnp.concatenate([src_box, src_depth, src_dim, src_angle], axis=-1)  # (L,N,35)
        src_pack = jnp.transpose(src_pack, (0, 2, 1))                                  # (L,35,N)

        tgt_box = jnp.concatenate([t['boxes_3d'] for t in targets], 0).astype(jnp.float32)
        tgt_depth = jnp.concatenate([t['depth'] for t in targets], 0).astype(jnp.float32)
        tgt_dim = jnp.concatenate([t['size_3d'] for t in targets], 0).astype(jnp.float32)
        head_cls = jnp.concatenate([t['heading_bin'] for t in targets], 0).reshape(-1, 1).astype(jnp.float32)
        head_res = jnp.concatenate([t['heading_res'] for t in targets], 0).reshape(-1, 1).astype(jnp.float32)
        tgt_pack = jnp.concatenate([tgt_box, tgt_depth, tgt_dim, head_cls, head_res], axis=-1)  # (N,12)
        tgt_pack = jnp.transpose(tgt_pack, (1, 0))                                     # (12,N)

        # pad pairs to a lane-dense multiple of 128 (pad rows are masked in-kernel)
        N_pad = max(128, ((N + 127) // 128) * 128)
        src_pack = jnp.pad(src_pack, ((0, 0), (0, 0), (0, N_pad - N)))
        tgt_pack = jnp.pad(tgt_pack, ((0, 0), (0, N_pad - N)))

        # classification targets: (B, Q) int32 class map (one-hot is built in-kernel)
        target_classes = jnp.full((B, Q), self.num_classes, jnp.int32)
        target_classes = target_classes.at[batch_idx, src_idx].set(labels_o)

        n_scalar = jnp.array([N], jnp.int32)

        # output rows: 7 loss sums + B cardinalities, padded to a sublane multiple of 8
        ROWS = ((7 + B + 7) // 8) * 8

        out = pl.pallas_call(
            _criterion_kernel,
            out_shape=jax.ShapeDtypeStruct((L, ROWS, 128), jnp.float32),
            grid_spec=pltpu.PrefetchScalarGridSpec(
                num_scalar_prefetch=1,
                grid=(L,),
                in_specs=[
                    pl.BlockSpec((None, B, C, Q), lambda l, n: (l, 0, 0, 0)),   # logits (per layer)
                    pl.BlockSpec((B, Q), lambda l, n: (0, 0)),                  # class map (shared)
                    pl.BlockSpec((None, F_SRC, N_pad), lambda l, n: (l, 0, 0)),  # src pack (per layer)
                    pl.BlockSpec((F_TGT, N_pad), lambda l, n: (0, 0)),          # tgt pack (shared)
                ],
                out_specs=pl.BlockSpec((None, ROWS, 128), lambda l, n: (l, 0, 0)),
            ),
            compiler_params=pltpu.CompilerParams(
                dimension_semantics=("parallel",)),
        )(n_scalar, logits_t, target_classes, src_pack, tgt_pack)

        # -------- assemble the loss dict (cheap scalar glue) --------
        nb = jnp.float32(num_boxes)
        tgt_len = jnp.asarray(sizes, jnp.float32)
        losses = {}
        for l in range(L):
            sfx = '' if l == 0 else f'_{l - 1}'
            row = out[l]
            if 'labels' in self.applied_losses:
                # sigmoid_focal_loss(...).mean(1).sum()/num_boxes * Q  ==  total_sum / num_boxes
                losses['loss_ce' + sfx] = row[0, 0] / nb
                if l == 0:
                    m_logits = outputs['pred_logits'][batch_idx, src_idx]
                    acc = 100.0 * jnp.mean(
                        (jnp.argmax(m_logits, axis=-1) == labels_o).astype(jnp.float32))
                    losses['class_error'] = 100.0 - acc
            if 'cardinality' in self.applied_losses:
                losses['cardinality_error' + sfx] = jnp.mean(jnp.abs(row[7:7 + B, 0] - tgt_len))
            if 'center' in self.applied_losses:
                losses['loss_center' + sfx] = row[1, 0] / nb
            if 'boxes' in self.applied_losses:
                losses['loss_bbox' + sfx] = row[2, 0] / nb
                losses['loss_giou' + sfx] = row[3, 0] / nb
            if 'depths' in self.applied_losses:
                losses['loss_depth' + sfx] = row[4, 0] / nb
            if 'dims' in self.applied_losses:
                # compensation_weight (detached) * relative dim L1 == absolute dim L1 sum
                losses['loss_dim' + sfx] = row[5, 0] / nb
            if 'angles' in self.applied_losses:
                losses['loss_angle' + sfx] = row[6, 0] / nb
        return losses


# --------------------------------------------------------------------------- demo
if __name__ == "__main__":
    key = jax.random.PRNGKey(0)
    B, Q, C = 2, 16, NUM_CLASSES
    NT = 4          # ground-truth boxes per image
    N_AUX = 2       # aux decoder heads in the demo
    ks = jax.random.split(key, 32)

    def make_head(k):
        kk = jax.random.split(k, 8)
        return {
            'pred_logits': jax.random.normal(kk[0], (B, Q, C), jnp.float32),
            'pred_boxes': jnp.concatenate([
                jax.random.uniform(kk[1], (B, Q, 2), minval=0.2, maxval=0.8),
                jax.random.uniform(kk[2], (B, Q, 4), minval=0.05, maxval=0.3)], axis=-1),
            'pred_depth': jnp.concatenate([
                jax.random.uniform(kk[3], (B, Q, 1), minval=5.0, maxval=60.0),
                jax.random.uniform(kk[4], (B, Q, 1), minval=-1.0, maxval=1.0)], axis=-1),
            'pred_3d_dim': jax.random.uniform(kk[5], (B, Q, 3), minval=0.5, maxval=2.0),
            'pred_angle': jax.random.normal(kk[6], (B, Q, 24), jnp.float32),
        }

    outputs = make_head(ks[0])
    outputs['aux_outputs'] = [make_head(ks[1 + i]) for i in range(N_AUX)]

    targets = []
    for b in range(B):
        kb = jax.random.split(ks[8 + b], 8)
        targets.append({
            'labels': jax.random.randint(kb[0], (NT,), 0, C),
            'boxes_3d': jnp.concatenate([
                jax.random.uniform(kb[1], (NT, 2), minval=0.2, maxval=0.8),
                jax.random.uniform(kb[2], (NT, 4), minval=0.05, maxval=0.3)], axis=-1),
            'depth': jax.random.uniform(kb[3], (NT, 1), minval=5.0, maxval=60.0),
            'size_3d': jax.random.uniform(kb[4], (NT, 3), minval=0.5, maxval=2.0),
            'heading_bin': jax.random.randint(kb[5], (NT, 1), 0, 12),
            'heading_res': jax.random.uniform(kb[6], (NT, 1), minval=-0.3, maxval=0.3),
        })

    criterion = SetCriterionPallas(
        num_classes=C, focal_alpha=FOCAL_ALPHA,
        applied_losses=['labels', 'cardinality', 'boxes', 'depths', 'dims', 'angles', 'center'],
        group_num=11)

    losses = criterion(outputs, targets)
    for v in losses.values():
        jax.block_until_ready(v)
    print("KERNEL_OK")
</pallas_src>

<mosaic_0001>
module attributes {stable_mosaic.version = 11 : i64} {
  func.func @_criterion_kernel(%arg0: i32, %arg1: memref<1xi32, #tpu.memory_space<smem>>, %arg2: memref<1x2x3x16xf32, #tpu.memory_space<vmem>>, %arg3: memref<2x16xi32, #tpu.memory_space<vmem>>, %arg4: memref<1x35x128xf32, #tpu.memory_space<vmem>>, %arg5: memref<12x128xf32, #tpu.memory_space<vmem>>, %arg6: memref<1x16x128xf32, #tpu.memory_space<vmem>>) attributes {dimension_semantics = [#tpu.dimension_semantics<parallel>], iteration_bounds = array<i64: 3>, scalar_prefetch = 1 : i64, scratch_operands = 0 : i64, tpu.core_type = #tpu.core_type<tc>, window_params = [{transform_indices = @transform_0, window_bounds = array<i64: 1, 2, 3, 16>}, {pipeline_mode = #tpu.pipeline_mode<synchronous>, transform_indices = @transform_1, window_bounds = array<i64: 2, 16>}, {transform_indices = @transform_2, window_bounds = array<i64: 1, 35, 128>}, {pipeline_mode = #tpu.pipeline_mode<synchronous>, transform_indices = @transform_3, window_bounds = array<i64: 12, 128>}, {transform_indices = @transform_4, window_bounds = array<i64: 1, 16, 128>}]} {
    %c0 = arith.constant 0 : index
    %c0_0 = arith.constant 0 : index
    %c0_1 = arith.constant 0 : index
    %c0_2 = arith.constant 0 : index
    %0 = vector.load %arg2[%c0, %c0_0, %c0_1, %c0_2] : memref<1x2x3x16xf32, #tpu.memory_space<vmem>>, vector<1x2x3x16xf32>
    %1 = vector.shape_cast %0 : vector<1x2x3x16xf32> to vector<2x3x16xf32>
    %c0_3 = arith.constant 0 : index
    %c0_4 = arith.constant 0 : index
    %2 = vector.load %arg3[%c0_3, %c0_4] : memref<2x16xi32, #tpu.memory_space<vmem>>, vector<2x16xi32>
    %3 = tpu.iota {dimensions = array<i32: 1>} : vector<2x3x16xi32>
    %4 = vector.shape_cast %2 : vector<2x16xi32> to vector<2x1x16xi32>
    %5 = vector.broadcast %4 : vector<2x1x16xi32> to vector<2x3x16xi32>
    %6 = arith.cmpi eq, %3, %5 : vector<2x3x16xi32>
    %7 = arith.extui %6 : vector<2x3x16xi1> to vector<2x3x16xi32>
    %8 = arith.sitofp %7 : vector<2x3x16xi32> to vector<2x3x16xf32>
    %9 = math.absf %1 : vector<2x3x16xf32>
    %cst = arith.constant 0.000000e+00 : f32
    %10 = vector.broadcast %cst : f32 to vector<2x3x16xf32>
    %11 = arith.subf %10, %9 : vector<2x3x16xf32>
    %12 = math.exp %11 : vector<2x3x16xf32>
    %cst_5 = arith.constant 1.000000e+00 : f32
    %13 = vector.broadcast %cst_5 : f32 to vector<2x3x16xf32>
    %14 = arith.addf %13, %12 : vector<2x3x16xf32>
    %cst_6 = arith.constant 1.000000e+00 : f32
    %15 = vector.broadcast %cst_6 : f32 to vector<2x3x16xf32>
    %16 = arith.divf %15, %14 : vector<2x3x16xf32>
    %cst_7 = arith.constant 0.000000e+00 : f32
    %17 = vector.broadcast %cst_7 : f32 to vector<2x3x16xf32>
    %18 = arith.cmpf oge, %1, %17 : vector<2x3x16xf32>
    %19 = arith.mulf %12, %16 : vector<2x3x16xf32>
    %20 = arith.select %18, %16, %19 : vector<2x3x16xi1>, vector<2x3x16xf32>
    %cst_8 = arith.constant 0.000000e+00 : f32
    %21 = vector.broadcast %cst_8 : f32 to vector<2x3x16xf32>
    %22 = arith.maximumf %1, %21 : vector<2x3x16xf32>
    %23 = arith.mulf %1, %8 : vector<2x3x16xf32>
    %24 = arith.subf %22, %23 : vector<2x3x16xf32>
    %cst_9 = arith.constant 1.000000e+00 : f32
    %25 = vector.broadcast %cst_9 : f32 to vector<2x3x16xf32>
    %26 = arith.addf %25, %12 : vector<2x3x16xf32>
    %27 = math.log %26 : vector<2x3x16xf32>
    %28 = arith.addf %24, %27 : vector<2x3x16xf32>
    %29 = arith.mulf %20, %8 : vector<2x3x16xf32>
    %cst_10 = arith.constant 1.000000e+00 : f32
    %30 = vector.broadcast %cst_10 : f32 to vector<2x3x16xf32>
    %31 = arith.subf %30, %20 : vector<2x3x16xf32>
    %cst_11 = arith.constant 1.000000e+00 : f32
    %32 = vector.broadcast %cst_11 : f32 to vector<2x3x16xf32>
    %33 = arith.subf %32, %8 : vector<2x3x16xf32>
    %34 = arith.mulf %31, %33 : vector<2x3x16xf32>
    %35 = arith.addf %29, %34 : vector<2x3x16xf32>
    %cst_12 = arith.constant 2.500000e-01 : f32
    %36 = vector.broadcast %cst_12 : f32 to vector<2x3x16xf32>
    %37 = arith.mulf %36, %8 : vector<2x3x16xf32>
    %cst_13 = arith.constant 1.000000e+00 : f32
    %38 = vector.broadcast %cst_13 : f32 to vector<2x3x16xf32>
    %39 = arith.subf %38, %8 : vector<2x3x16xf32>
    %cst_14 = arith.constant 7.500000e-01 : f32
    %40 = vector.broadcast %cst_14 : f32 to vector<2x3x16xf32>
    %41 = arith.mulf %40, %39 : vector<2x3x16xf32>
    %42 = arith.addf %37, %41 : vector<2x3x16xf32>
    %43 = arith.mulf %42, %28 : vector<2x3x16xf32>
    %cst_15 = arith.constant 1.000000e+00 : f32
    %44 = vector.broadcast %cst_15 : f32 to vector<2x3x16xf32>
    %45 = arith.subf %44, %35 : vector<2x3x16xf32>
    %46 = arith.mulf %45, %45 : vector<2x3x16xf32>
    %47 = arith.mulf %43, %46 : vector<2x3x16xf32>
    %48 = vector.shape_cast %47 : vector<2x3x16xf32> to vector<1x2x3x16xf32>
    %cst_16 = arith.constant dense<0.000000e+00> : vector<1xf32>
    %49 = vector.multi_reduction <add>, %48, %cst_16 [1, 2, 3] : vector<1x2x3x16xf32> to vector<1xf32>
    %50 = vector.shape_cast %49 : vector<1xf32> to vector<1x1x1x1xf32>
    %51 = vector.extract %50[0, 0, 0, 0] : f32 from vector<1x1x1x1xf32>
    %52 = vector.extract_strided_slice %1 {offsets = [0, 0, 0], sizes = [2, 2, 16], strides = [1, 1, 1]} : vector<2x3x16xf32> to vector<2x2x16xf32>
    %cst_17 = arith.constant dense<0xFF800000> : vector<2x16xf32>
    %53 = vector.multi_reduction <maximumf>, %52, %cst_17 [1] : vector<2x2x16xf32> to vector<2x16xf32>
    %54 = vector.extract_strided_slice %1 {offsets = [0, 2, 0], sizes = [2, 1, 16], strides = [1, 1, 1]} : vector<2x3x16xf32> to vector<2x1x16xf32>
    %55 = vector.shape_cast %54 : vector<2x1x16xf32> to vector<2x16xf32>
    %56 = arith.cmpf oge, %53, %55 : vector<2x16xf32>
    %57 = arith.extui %56 : vector<2x16xi1> to vector<2x16xi32>
    %58 = arith.sitofp %57 : vector<2x16xi32> to vector<2x16xf32>
    %cst_18 = arith.constant dense<0.000000e+00> : vector<2xf32>
    %59 = vector.multi_reduction <add>, %58, %cst_18 [1] : vector<2x16xf32> to vector<2xf32>
    %60 = vector.shape_cast %59 : vector<2xf32> to vector<2x1xf32>
    %c0_19 = arith.constant 0 : index
    %61 = memref.load %arg1[%c0_19] : memref<1xi32, #tpu.memory_space<smem>>
    %c0_20 = arith.constant 0 : index
    %c0_21 = arith.constant 0 : index
    %c0_22 = arith.constant 0 : index
    %62 = vector.load %arg4[%c0_20, %c0_21, %c0_22] : memref<1x35x128xf32, #tpu.memory_space<vmem>>, vector<1x35x128xf32>
    %63 = vector.shape_cast %62 : vector<1x35x128xf32> to vector<35x128xf32>
    %c0_23 = arith.constant 0 : index
    %c0_24 = arith.constant 0 : index
    %64 = vector.load %arg5[%c0_23, %c0_24] : memref<12x128xf32, #tpu.memory_space<vmem>>, vector<12x128xf32>
    %65 = tpu.iota {dimensions = array<i32: 1>} : vector<1x128xi32>
    %66 = vector.broadcast %61 : i32 to vector<1x128xi32>
    %67 = arith.cmpi slt, %65, %66 : vector<1x128xi32>
    %68 = arith.extui %67 : vector<1x128xi1> to vector<1x128xi32>
    %69 = arith.sitofp %68 : vector<1x128xi32> to vector<1x128xf32>
    %cst_25 = arith.constant 0.000000e+00 : f32
    %70 = vector.broadcast %cst_25 : f32 to vector<1x128xf32>
    %71 = arith.cmpf ogt, %69, %70 : vector<1x128xf32>
    %72 = vector.extract_strided_slice %63 {offsets = [0, 0], sizes = [6, 128], strides = [1, 1]} : vector<35x128xf32> to vector<6x128xf32>
    %73 = vector.extract_strided_slice %64 {offsets = [0, 0], sizes = [6, 128], strides = [1, 1]} : vector<12x128xf32> to vector<6x128xf32>
    %74 = vector.extract_strided_slice %72 {offsets = [0, 0], sizes = [2, 128], strides = [1, 1]} : vector<6x128xf32> to vector<2x128xf32>
    %75 = vector.extract_strided_slice %73 {offsets = [0, 0], sizes = [2, 128], strides = [1, 1]} : vector<6x128xf32> to vector<2x128xf32>
    %76 = arith.subf %74, %75 : vector<2x128xf32>
    %77 = math.absf %76 : vector<2x128xf32>
    %78 = vector.broadcast %69 : vector<1x128xf32> to vector<2x128xf32>
    %79 = arith.mulf %77, %78 : vector<2x128xf32>
    %80 = vector.shape_cast %79 : vector<2x128xf32> to vector<1x2x128xf32>
    %cst_26 = arith.constant dense<0.000000e+00> : vector<1xf32>
    %81 = vector.multi_reduction <add>, %80, %cst_26 [1, 2] : vector<1x2x128xf32> to vector<1xf32>
    %82 = vector.shape_cast %81 : vector<1xf32> to vector<1x1x1xf32>
    %83 = vector.extract %82[0, 0, 0] : f32 from vector<1x1x1xf32>
    %84 = vector.extract_strided_slice %72 {offsets = [2, 0], sizes = [4, 128], strides = [1, 1]} : vector<6x128xf32> to vector<4x128xf32>
    %85 = vector.extract_strided_slice %73 {offsets = [2, 0], sizes = [4, 128], strides = [1, 1]} : vector<6x128xf32> to vector<4x128xf32>
    %86 = arith.subf %84, %85 : vector<4x128xf32>
    %87 = math.absf %86 : vector<4x128xf32>
    %88 = vector.broadcast %69 : vector<1x128xf32> to vector<4x128xf32>
    %89 = arith.mulf %87, %88 : vector<4x128xf32>
    %90 = vector.shape_cast %89 : vector<4x128xf32> to vector<1x4x128xf32>
    %cst_27 = arith.constant dense<0.000000e+00> : vector<1xf32>
    %91 = vector.multi_reduction <add>, %90, %cst_27 [1, 2] : vector<1x4x128xf32> to vector<1xf32>
    %92 = vector.shape_cast %91 : vector<1xf32> to vector<1x1x1xf32>
    %93 = vector.extract %92[0, 0, 0] : f32 from vector<1x1x1xf32>
    %94 = vector.extract_strided_slice %72 {offsets = [0, 0], sizes = [1, 128], strides = [1, 1]} : vector<6x128xf32> to vector<1x128xf32>
    %95 = vector.extract_strided_slice %72 {offsets = [2, 0], sizes = [1, 128], strides = [1, 1]} : vector<6x128xf32> to vector<1x128xf32>
    %96 = arith.subf %94, %95 : vector<1x128xf32>
    %97 = vector.extract_strided_slice %72 {offsets = [1, 0], sizes = [1, 128], strides = [1, 1]} : vector<6x128xf32> to vector<1x128xf32>
    %98 = vector.extract_strided_slice %72 {offsets = [4, 0], sizes = [1, 128], strides = [1, 1]} : vector<6x128xf32> to vector<1x128xf32>
    %99 = arith.subf %97, %98 : vector<1x128xf32>
    %100 = vector.extract_strided_slice %72 {offsets = [0, 0], sizes = [1, 128], strides = [1, 1]} : vector<6x128xf32> to vector<1x128xf32>
    %101 = vector.extract_strided_slice %72 {offsets = [3, 0], sizes = [1, 128], strides = [1, 1]} : vector<6x128xf32> to vector<1x128xf32>
    %102 = arith.addf %100, %101 : vector<1x128xf32>
    %103 = vector.extract_strided_slice %72 {offsets = [1, 0], sizes = [1, 128], strides = [1, 1]} : vector<6x128xf32> to vector<1x128xf32>
    %104 = vector.extract_strided_slice %72 {offsets = [5, 0], sizes = [1, 128], strides = [1, 1]} : vector<6x128xf32> to vector<1x128xf32>
    %105 = arith.addf %103, %104 : vector<1x128xf32>
    %106 = vector.extract_strided_slice %73 {offsets = [0, 0], sizes = [1, 128], strides = [1, 1]} : vector<6x128xf32> to vector<1x128xf32>
    %107 = vector.extract_strided_slice %73 {offsets = [2, 0], sizes = [1, 128], strides = [1, 1]} : vector<6x128xf32> to vector<1x128xf32>
    %108 = arith.subf %106, %107 : vector<1x128xf32>
    %109 = vector.extract_strided_slice %73 {offsets = [1, 0], sizes = [1, 128], strides = [1, 1]} : vector<6x128xf32> to vector<1x128xf32>
    %110 = vector.extract_strided_slice %73 {offsets = [4, 0], sizes = [1, 128], strides = [1, 1]} : vector<6x128xf32> to vector<1x128xf32>
    %111 = arith.subf %109, %110 : vector<1x128xf32>
    %112 = vector.extract_strided_slice %73 {offsets = [0, 0], sizes = [1, 128], strides = [1, 1]} : vector<6x128xf32> to vector<1x128xf32>
    %113 = vector.extract_strided_slice %73 {offsets = [3, 0], sizes = [1, 128], strides = [1, 1]} : vector<6x128xf32> to vector<1x128xf32>
    %114 = arith.addf %112, %113 : vector<1x128xf32>
    %115 = vector.extract_strided_slice %73 {offsets = [1, 0], sizes = [1, 128], strides = [1, 1]} : vector<6x128xf32> to vector<1x128xf32>
    %116 = vector.extract_strided_slice %73 {offsets = [5, 0], sizes = [1, 128], strides = [1, 1]} : vector<6x128xf32> to vector<1x128xf32>
    %117 = arith.addf %115, %116 : vector<1x128xf32>
    %118 = arith.subf %102, %96 : vector<1x128xf32>
    %119 = arith.subf %105, %99 : vector<1x128xf32>
    %120 = arith.mulf %118, %119 : vector<1x128xf32>
    %121 = arith.subf %114, %108 : vector<1x128xf32>
    %122 = arith.subf %117, %111 : vector<1x128xf32>
    %123 = arith.mulf %121, %122 : vector<1x128xf32>
    %124 = arith.minimumf %102, %114 : vector<1x128xf32>
    %125 = arith.maximumf %96, %108 : vector<1x128xf32>
    %126 = arith.subf %124, %125 : vector<1x128xf32>
    %cst_28 = arith.constant 0.000000e+00 : f32
    %127 = vector.broadcast %cst_28 : f32 to vector<1x128xf32>
    %128 = arith.maximumf %126, %127 : vector<1x128xf32>
    %129 = arith.minimumf %105, %117 : vector<1x128xf32>
    %130 = arith.maximumf %99, %111 : vector<1x128xf32>
    %131 = arith.subf %129, %130 : vector<1x128xf32>
    %cst_29 = arith.constant 0.000000e+00 : f32
    %132 = vector.broadcast %cst_29 : f32 to vector<1x128xf32>
    %133 = arith.maximumf %131, %132 : vector<1x128xf32>
    %134 = arith.mulf %128, %133 : vector<1x128xf32>
    %135 = arith.addf %120, %123 : vector<1x128xf32>
    %136 = arith.subf %135, %134 : vector<1x128xf32>
    %137 = arith.maximumf %102, %114 : vector<1x128xf32>
    %138 = arith.minimumf %96, %108 : vector<1x128xf32>
    %139 = arith.subf %137, %138 : vector<1x128xf32>
    %140 = arith.maximumf %105, %117 : vector<1x128xf32>
    %141 = arith.minimumf %99, %111 : vector<1x128xf32>
    %142 = arith.subf %140, %141 : vector<1x128xf32>
    %143 = arith.mulf %139, %142 : vector<1x128xf32>
    %cst_30 = arith.constant 1.000000e+00 : f32
    %144 = vector.broadcast %cst_30 : f32 to vector<1x128xf32>
    %145 = arith.select %71, %136, %144 : vector<1x128xi1>, vector<1x128xf32>
    %cst_31 = arith.constant 1.000000e+00 : f32
    %146 = vector.broadcast %cst_31 : f32 to vector<1x128xf32>
    %147 = arith.select %71, %143, %146 : vector<1x128xi1>, vector<1x128xf32>
    %148 = arith.divf %134, %145 : vector<1x128xf32>
    %149 = arith.subf %147, %145 : vector<1x128xf32>
    %150 = arith.divf %149, %147 : vector<1x128xf32>
    %151 = arith.subf %148, %150 : vector<1x128xf32>
    %cst_32 = arith.constant 1.000000e+00 : f32
    %152 = vector.broadcast %cst_32 : f32 to vector<1x128xf32>
    %153 = arith.subf %152, %151 : vector<1x128xf32>
    %154 = arith.mulf %153, %69 : vector<1x128xf32>
    %155 = vector.shape_cast %154 : vector<1x128xf32> to vector<1x1x128xf32>
    %cst_33 = arith.constant dense<0.000000e+00> : vector<1xf32>
    %156 = vector.multi_reduction <add>, %155, %cst_33 [1, 2] : vector<1x1x128xf32> to vector<1xf32>
    %157 = vector.shape_cast %156 : vector<1xf32> to vector<1x1x1xf32>
    %158 = vector.extract %157[0, 0, 0] : f32 from vector<1x1x1xf32>
    %159 = vector.extract_strided_slice %63 {offsets = [6, 0], sizes = [2, 128], strides = [1, 1]} : vector<35x128xf32> to vector<2x128xf32>
    %160 = vector.extract_strided_slice %64 {offsets = [6, 0], sizes = [1, 128], strides = [1, 1]} : vector<12x128xf32> to vector<1x128xf32>
    %161 = vector.extract_strided_slice %159 {offsets = [1, 0], sizes = [1, 128], strides = [1, 1]} : vector<2x128xf32> to vector<1x128xf32>
    %cst_34 = arith.constant 0.000000e+00 : f32
    %162 = vector.broadcast %cst_34 : f32 to vector<1x128xf32>
    %163 = arith.subf %162, %161 : vector<1x128xf32>
    %164 = math.exp %163 : vector<1x128xf32>
    %cst_35 = arith.constant 1.414200e+00 : f32
    %165 = vector.broadcast %cst_35 : f32 to vector<1x128xf32>
    %166 = arith.mulf %165, %164 : vector<1x128xf32>
    %167 = vector.extract_strided_slice %159 {offsets = [0, 0], sizes = [1, 128], strides = [1, 1]} : vector<2x128xf32> to vector<1x128xf32>
    %168 = arith.subf %167, %160 : vector<1x128xf32>
    %169 = math.absf %168 : vector<1x128xf32>
    %170 = arith.mulf %166, %169 : vector<1x128xf32>
    %171 = vector.extract_strided_slice %159 {offsets = [1, 0], sizes = [1, 128], strides = [1, 1]} : vector<2x128xf32> to vector<1x128xf32>
    %172 = arith.addf %170, %171 : vector<1x128xf32>
    %173 = arith.mulf %172, %69 : vector<1x128xf32>
    %174 = vector.shape_cast %173 : vector<1x128xf32> to vector<1x1x128xf32>
    %cst_36 = arith.constant dense<0.000000e+00> : vector<1xf32>
    %175 = vector.multi_reduction <add>, %174, %cst_36 [1, 2] : vector<1x1x128xf32> to vector<1xf32>
    %176 = vector.shape_cast %175 : vector<1xf32> to vector<1x1x1xf32>
    %177 = vector.extract %176[0, 0, 0] : f32 from vector<1x1x1xf32>
    %178 = vector.extract_strided_slice %63 {offsets = [8, 0], sizes = [3, 128], strides = [1, 1]} : vector<35x128xf32> to vector<3x128xf32>
    %179 = vector.extract_strided_slice %64 {offsets = [7, 0], sizes = [3, 128], strides = [1, 1]} : vector<12x128xf32> to vector<3x128xf32>
    %180 = arith.subf %178, %179 : vector<3x128xf32>
    %181 = math.absf %180 : vector<3x128xf32>
    %182 = vector.broadcast %69 : vector<1x128xf32> to vector<3x128xf32>
    %183 = arith.mulf %181, %182 : vector<3x128xf32>
    %184 = vector.shape_cast %183 : vector<3x128xf32> to vector<1x3x128xf32>
    %cst_37 = arith.constant dense<0.000000e+00> : vector<1xf32>
    %185 = vector.multi_reduction <add>, %184, %cst_37 [1, 2] : vector<1x3x128xf32> to vector<1xf32>
    %186 = vector.shape_cast %185 : vector<1xf32> to vector<1x1x1xf32>
    %187 = vector.extract %186[0, 0, 0] : f32 from vector<1x1x1xf32>
    %188 = vector.extract_strided_slice %63 {offsets = [11, 0], sizes = [24, 128], strides = [1, 1]} : vector<35x128xf32> to vector<24x128xf32>
    %189 = vector.extract_strided_slice %64 {offsets = [10, 0], sizes = [1, 128], strides = [1, 1]} : vector<12x128xf32> to vector<1x128xf32>
    %190 = arith.fptosi %189 : vector<1x128xf32> to vector<1x128xi32>
    %191 = tpu.iota {dimensions = array<i32: 0>} : vector<12x128xi32>
    %192 = vector.broadcast %190 : vector<1x128xi32> to vector<12x128xi32>
    %193 = arith.cmpi eq, %191, %192 : vector<12x128xi32>
    %194 = arith.extui %193 : vector<12x128xi1> to vector<12x128xi32>
    %195 = arith.sitofp %194 : vector<12x128xi32> to vector<12x128xf32>
    %196 = vector.extract_strided_slice %188 {offsets = [0, 0], sizes = [12, 128], strides = [1, 1]} : vector<24x128xf32> to vector<12x128xf32>
    %cst_38 = arith.constant dense<0xFF800000> : vector<128xf32>
    %197 = vector.multi_reduction <maximumf>, %196, %cst_38 [0] : vector<12x128xf32> to vector<128xf32>
    %198 = vector.shape_cast %197 : vector<128xf32> to vector<1x128xf32>
    %199 = vector.broadcast %198 : vector<1x128xf32> to vector<12x128xf32>
    %200 = arith.subf %196, %199 : vector<12x128xf32>
    %201 = math.exp %200 : vector<12x128xf32>
    %cst_39 = arith.constant dense<0.000000e+00> : vector<128xf32>
    %202 = vector.multi_reduction <add>, %201, %cst_39 [0] : vector<12x128xf32> to vector<128xf32>
    %203 = vector.shape_cast %202 : vector<128xf32> to vector<1x128xf32>
    %204 = math.log %203 : vector<1x128xf32>
    %205 = arith.addf %198, %204 : vector<1x128xf32>
    %206 = arith.mulf %196, %195 : vector<12x128xf32>
    %cst_40 = arith.constant dense<0.000000e+00> : vector<128xf32>
    %207 = vector.multi_reduction <add>, %206, %cst_40 [0] : vector<12x128xf32> to vector<128xf32>
    %208 = vector.shape_cast %207 : vector<128xf32> to vector<1x128xf32>
    %209 = vector.extract_strided_slice %188 {offsets = [12, 0], sizes = [12, 128], strides = [1, 1]} : vector<24x128xf32> to vector<12x128xf32>
    %210 = arith.mulf %209, %195 : vector<12x128xf32>
    %cst_41 = arith.constant dense<0.000000e+00> : vector<128xf32>
    %211 = vector.multi_reduction <add>, %210, %cst_41 [0] : vector<12x128xf32> to vector<128xf32>
    %212 = vector.shape_cast %211 : vector<128xf32> to vector<1x128xf32>
    %213 = vector.extract_strided_slice %64 {offsets = [11, 0], sizes = [1, 128], strides = [1, 1]} : vector<12x128xf32> to vector<1x128xf32>
    %214 = arith.subf %212, %213 : vector<1x128xf32>
    %215 = math.absf %214 : vector<1x128xf32>
    %216 = arith.subf %205, %208 : vector<1x128xf32>
    %217 = arith.addf %216, %215 : vector<1x128xf32>
    %218 = arith.mulf %217, %69 : vector<1x128xf32>
    %219 = vector.shape_cast %218 : vector<1x128xf32> to vector<1x1x128xf32>
    %cst_42 = arith.constant dense<0.000000e+00> : vector<1xf32>
    %220 = vector.multi_reduction <add>, %219, %cst_42 [1, 2] : vector<1x1x128xf32> to vector<1xf32>
    %221 = vector.shape_cast %220 : vector<1xf32> to vector<1x1x1xf32>
    %222 = vector.extract %221[0, 0, 0] : f32 from vector<1x1x1xf32>
    %223 = vector.broadcast %51 : f32 to vector<1x1xf32>
    %224 = vector.broadcast %83 : f32 to vector<1x1xf32>
    %225 = vector.broadcast %93 : f32 to vector<1x1xf32>
    %226 = vector.broadcast %158 : f32 to vector<1x1xf32>
    %227 = vector.broadcast %177 : f32 to vector<1x1xf32>
    %228 = vector.broadcast %187 : f32 to vector<1x1xf32>
    %229 = vector.broadcast %222 : f32 to vector<1x1xf32>
    %cst_43 = arith.constant 0.000000e+00 : f32
    %230 = vector.broadcast %cst_43 : f32 to vector<7x1xf32>
    %231 = tpu.concatenate %223, %224, %225, %226, %227, %228, %229, %60, %230 in 0 : vector<1x1xf32>, vector<1x1xf32>, vector<1x1xf32>, vector<1x1xf32>, vector<1x1xf32>, vector<1x1xf32>, vector<1x1xf32>, vector<2x1xf32>, vector<7x1xf32> -> vector<16x1xf32>
    %232 = vector.shape_cast %231 : vector<16x1xf32> to vector<16x1xf32>
    %233 = vector.broadcast %232 : vector<16x1xf32> to vector<16x128xf32>
    %c0_44 = arith.constant 0 : index
    %c0_45 = arith.constant 0 : index
    %c0_46 = arith.constant 0 : index
    %234 = vector.load %arg6[%c0_44, %c0_45, %c0_46] : memref<1x16x128xf32, #tpu.memory_space<vmem>>, vector<1x16x128xf32>
    %235 = vector.shape_cast %234 : vector<1x16x128xf32> to vector<16x128xf32>
    %236 = vector.shape_cast %233 : vector<16x128xf32> to vector<1x16x128xf32>
    tpu.vector_store %arg6[%c0_44, %c0_45, %c0_46], %236 {strides = array<i32>} : memref<1x16x128xf32, #tpu.memory_space<vmem>>, vector<1x16x128xf32>,
    return
  }
  func.func @transform_0(%arg0: i32, %arg1: memref<1xi32, #tpu.memory_space<smem>>) -> (i32, i32, i32, i32) {
    %c0_i32 = arith.constant 0 : i32
    %c0_i32_0 = arith.constant 0 : i32
    %c0_i32_1 = arith.constant 0 : i32
    %c0_i32_2 = arith.constant 0 : i32
    return %arg0, %c0_i32, %c0_i32_0, %c0_i32_1 : i32, i32, i32, i32
  }
  func.func @transform_1(%arg0: i32, %arg1: memref<1xi32, #tpu.memory_space<smem>>) -> (i32, i32) {
    %c0_i32 = arith.constant 0 : i32
    %c0_i32_0 = arith.constant 0 : i32
    %c0_i32_1 = arith.constant 0 : i32
    return %c0_i32, %c0_i32_0 : i32, i32
  }
  func.func @transform_2(%arg0: i32, %arg1: memref<1xi32, #tpu.memory_space<smem>>) -> (i32, i32, i32) {
    %c0_i32 = arith.constant 0 : i32
    %c0_i32_0 = arith.constant 0 : i32
    %c0_i32_1 = arith.constant 0 : i32
    return %arg0, %c0_i32, %c0_i32_0 : i32, i32, i32
  }
  func.func @transform_3(%arg0: i32, %arg1: memref<1xi32, #tpu.memory_space<smem>>) -> (i32, i32) {
    %c0_i32 = arith.constant 0 : i32
    %c0_i32_0 = arith.constant 0 : i32
    %c0_i32_1 = arith.constant 0 : i32
    return %c0_i32, %c0_i32_0 : i32, i32
  }
  func.func @transform_4(%arg0: i32, %arg1: memref<1xi32, #tpu.memory_space<smem>>) -> (i32, i32, i32) {
    %c0_i32 = arith.constant 0 : i32
    %c0_i32_0 = arith.constant 0 : i32
    %c0_i32_1 = arith.constant 0 : i32
    return %arg0, %c0_i32, %c0_i32_0 : i32, i32, i32
  }
}

</mosaic_0001>

<bundles_post_ra>
// kernel: tpu_custom_call.1
= control target key start
LH: loop header
LB: loop body
LE: loop exit
PB: predicated region body
PF: predicated region fallthrough
CT: control target
= control target key end

     0   :  { %s1464_s0 = inlined_call_operand.<no memory space> [shape: s32[1], index: 0, kind: input, shape index: {}]   ;;  %s1465_s1 = inlined_call_operand.vmem [shape: f32[3,2,3,16], index: 1, kind: input, shape index: {}]   ;;  %s1466_s2 = inlined_call_operand.vmem [shape: s32[2,16], index: 2, kind: input, shape index: {}]   ;;  %s1467_s3 = inlined_call_operand.hbm [shape: f32[3,35,128], index: 3, kind: input, shape index: {}]   ;;  %s1468_s4 = inlined_call_operand.vmem [shape: f32[12,128], index: 4, kind: input, shape index: {}]   ;;  %s1469_s5 = inlined_call_operand.hbm [shape: f32[3,16,128], index: 5, kind: output, shape index: {}]  }
   0x1   :  { %10 = sst [smem:[#allocation3]] %s1464_s0 }
   0x2   :  { %11 = vsyncpa [#allocation5], 0 }
   0x3   :  { %13 = vsyncpa [#allocation5 + $0x1], 0 }
   0x4   :  { %14 = vsyncpa [#allocation6], 0 }
   0x5   :  { %16 = vsyncpa [#allocation6 + $0x1], 0  ;;  %s1075_s20 = smov 0   ;;  %s1077_s21 = smov 0  }
   0x6   :  { %s1079_s22 = smov 0   ;;  %s1081_s23 = smov 0  }
   0x7 LB: > { %s1096_s0 = sadd.s32 4294967295, %s1034_s23   ;;  %s816_s24 = sadd.s32 4294967294, %s1034_s23   ;;  %s1034_s23 = sphi %s1081_s23, %s1491_s23   ;;  %s1030_s22 = sphi %s1079_s22, %s1490_s22   ;;  %s1026_s21 = sphi %s1077_s21, %s1489_s21   ;;  %s1022_s20 = sphi %s1075_s20, %s1488_s20  }
   0x8   : > { %s1100_s25 = sadd.s32 1, %s1034_s23   ;;  %s76_s26 = sadd.s32 1, %s1030_s22 }
   0x9   : > { %s73_s27 = ssub.s32 %s1034_s23, %s1100_s25  ;;  %p83_p0 = scmp.ne.s32.totalorder %s1030_s22, %s1026_s21 }
   0xa   : > { %p74_p1 = scmp.eq.s32.totalorder %s73_s27, 0  ;;  %p84_p2 = scmp.eq.s32.totalorder %s1034_s23, 0 }
   0xb   : > { %p89_p3 = scmp.ne.s32.totalorder %s1026_s21, %s1022_s20  ;;  %p90_p4 = scmp.eq.s32.totalorder %s1096_s0, 0 }
   0xc   : > { %s1112_s28 = scalar_select %p74_p1, %s1030_s22, %s76_s26  }
   0xd   : > { %p85_p5 = por %p84_p2, %p83_p0  ;;  %p1114_p6 = por %p90_p4, %p89_p3 }
   0xe   : > { %p134_p7 = scmp.eq.s32.totalorder %s1096_s0, 2  ;;  %p140_p8 = scmp.eq.s32.totalorder %s816_s24, 2 }
   0xf   : > { %p872_p9 = scmp.lt.s32.totalorder %s1034_s23, 3  ;;  %s174_s7 = sand.u32 1, %s1030_s22  }
  0x10   : > { %p1120_p10 = por %p134_p7, %p83_p0  ;;  %p1124_p11 = por %p140_p8, %p89_p3 }
  0x11   : > { %s839_s8 = smul.u32 40, %s1034_s23  ;;  %p1133_p12 = pnand %p872_p9, %p85_p5 }
  0x12   : > { %s838_s9 = smul.u32 40, %s174_s7  ;;  %s175_s17 = scalar_lea.sflag [#allocation5], %s174_s7 }
  0x13   : > { %s183_s12 = scalar_lea.hbm %s1467_s3, %s839_s8  ;;  %p942_p0 = pneg %p1133_p12 }
  0x14   : > { %s184_s14 = sshll.u32 %s183_s12, 4  ;;  %s178_s15 = scalar_lea.vmem [#allocation4], %s838_s9  ;;  %s185_s14 = int_to_ptr.hbm [resolvable:$true] %s184_s14 }
  0x15   : > { %s186_s16 = sshll.u32 %s178_s15, 4  ;;  %s938_s18 = sshra.s32 %s185_s14, 4  ;;  %s187_s16 = int_to_ptr.vmem [resolvable:$true] %s186_s16  ;;  %s939_s18 = int_to_ptr.hbm [resolvable:$true] %s938_s18 }
  0x16   : > { %s940_s19 = scalar_lea.hbm %s939_s18, 40  ;;  %s945_s27 = scalar_lea.hbm %s1467_s3, 120 }
  0x17   : > { %p941_p13 = scmp.ne.s32.totalorder %s939_s18, %s940_s19  ;;  %p946_p3 = scmp.lt.s32.totalorder %s939_s18, %s1467_s3 }
  0x18   : > { %p947_p4 = scmp.lt.s32.totalorder %s945_s27, %s940_s19 }
  0x19   : > { %p943_p1 = pnand %p942_p0, %p941_p13 }
  0x1a   : > { %p948_p5 = por %p947_p4, %p946_p3 }
  0x1b   : > { %p944_p2 = pneg %p943_p1 }
  0x1d   : > { %p949_p7 = pnand %p948_p5, %p944_p2 }
  0x1f   : > { %952 = shalt.err (!%p949_p7)
}
  0x20   : > { %s1036_s7 = smov 128   ;;  %s1037_s9 = smov 8  }
  0x21   : > { %867 = dma.hbm_to_vmem [thread:$0]  (!%p1133_p12), %s185_s14, 640, %s187_s16, %s175_s17, %s1036_s7, %s1036_s7, %s1037_s9  }
  0x22   : > { %p820_p8 = scmp.ge.s32.totalorder %s1034_s23, 1  ;;  %p194_p9 = scmp.lt.s32.totalorder %s1034_s23, 4 }
  0x24   : > { %p195_p13 = pnand %p820_p8, %p194_p9 }
  0x25   : > { %s1150_s11 = sand.u32 (!%p195_p13), 1, %s1026_s21  }
  0x26   : > { %198 = sbr.rel (%p195_p13) target bundleno = 427 (0x1ab), region = 36  ;;  %s201_s15 = scalar_lea.sflag (!%p195_p13), [#allocation5], %s1150_s11 }
  0x27   : > { %s840_s12 = smul.u32 (!%p195_p13), 40, %s1150_s11 }
  0x29   : > { %s1154_s18 = scalar_lea.vmem (!%p195_p13), [#allocation4], %s840_s12 }
  0x2b   : > { %1013 = dma.done.wait (%p1114_p6), %s201_s15, 640  }
  0x2c   : > { %1015 = vsyncadd (%p1114_p6), %s201_s15, 4294966656  ;;  %v243_v0 = vlaneseq  ;;  %s380_s13 = sld [smem:[#allocation3]]  ;;  %p235_p12 = scmp.lt.s32.totalorder %s1096_s0, 2  ;;  %v1163_v2 = vld [vmem:[%s1154_s18] sm:$0xff]  ;;  %vm398_vm1 = vcmask 1041408   ;;  %vm412_vm2 = vcmask 1043456  }
  0x2d   : > { %v1168_v3 = vld [vmem:[%s1468_s4] sm:$0xff]  ;;  %v528_v6 = vsub.f32 0.0, %v1163_v2  ;;  %v424_v7 = vrot.slane %v1163_v2, 2  ;;  %v427_v8 = vrot.slane %v1163_v2, 3  ;;  %v431_v9 = vrot.slane %v1163_v2, 4  ;;  %s837_s19 = sshll.u32 %s1096_s0, 4 }
  0x2e   : > { %v389_v1 = vand.u32 127, %v243_v0  ;;  %v395_v5 = vsub.f32 %v1163_v2, %v1168_v3  ;;  %s1175_s29 = scalar_select %p235_p12, %s1096_s0, 2  ;;  %v435_v10 = vrot.slane %v1168_v3, 2  ;;  %v1038_v14 = vmov 0.0   ;;  %v242_v26 = vld [vmem:[%s1466_s2] sm:$0x3] }
  0x2f   : > { %v529_v12 = vmul.f32 1.442695, %v528_v6  ;;  %v426_v13 = vsub.f32 %v1163_v2, %v424_v7  ;;  %v429_v16 = vsub.f32 %v1163_v2, %v427_v8  ;;  %v433_v17 = vadd.f32 %v431_v9, %v1163_v2  ;;  %s727_s27 = scalar_lea.hbm %s1469_s5, %s837_s19  ;;  %s716_s7 = scalar_lea.sflag [#allocation6], %s1150_s11 }
  0x30   : > { %v396_v11 = vand.u32 2147483647, %v395_v5  ;;  %v437_v18 = vsub.f32 %v1168_v3, %v435_v10  ;;  %v430_v20 = vadd.f32 %v427_v8, %v1163_v2  ;;  %v438_v21 = vrot.slane %v1168_v3, 3  ;;  %s836_s17 = sshll.u32 %s1175_s29, 3  ;;  %s821_s29 = sshll.u32 %s1150_s11, 4 }
  0x31   : > { %914 = vpow2.f32 %v529_v12  ;;  %v442_v23 = vrot.slane %v1168_v3, 4  ;;  %v446_v24 = vsub.f32 %v433_v17, %v429_v16  ;;  %s239_s8 = scalar_lea.vmem %s1465_s1, %s836_s17  ;;  %v245_v38 = vrot.slane %v242_v26, 1  ;;  %s234_s17 = scalar_lea.vmem [#allocation7], %s821_s29 }
  0x32   : > { %v390_v4 = vstv %s380_s13  ;;  %v533_v22 = vrot.slane %v396_v11, 7  ;;  %v458_v25 = vmax.f32 %v426_v13, %v437_v18  ;;  %v440_v29 = vsub.f32 %v1168_v3, %v438_v21  ;;  %v1203_v47 = vld [vmem:[%s239_s8] sm:$0x7]  ;;  %v1205_v52 = vld [vmem:[%s239_s8 + $0x4] sm:$0x7]  ;;  %s728_s8 = sshll.u32 %s234_s17, 4  ;;  %s729_s8 = int_to_ptr.vmem [resolvable:$true] %s728_s8 }
  0x33   : > { %vm391_vm0 = vcmp.lt.s32.totalorder %v389_v1, %v390_v4  ;;  %v441_v30 = vadd.f32 %v438_v21, %v1168_v3  ;;  %v444_v31 = vadd.f32 %v442_v23, %v1168_v3  ;;  %v445_v32 = vsub.f32 %v430_v20, %v426_v13  ;;  %s730_s10 = sshll.u32 %s727_s27, 4  ;;  %s731_s10 = int_to_ptr.hbm [resolvable:$true] %s730_s10 }
  0x34   : > { %v1182_v15 = vsel %vm391_vm0, 1.0, %v1038_v14  ;;  %v448_v33 = vrot.slane %v446_v24, 1  ;;  %v472_v34 = vmin.f32 %v426_v13, %v437_v18  ;;  %v462_v37 = vmax.f32 %v429_v16, %v440_v29 }
  0x35   : > { %v397_v19 = vmul.f32 %v1182_v15, %v396_v11  ;;  %v457_v36 = vmin.f32 %v430_v20, %v441_v30  ;;  %v451_v39 = vsub.f32 %v441_v30, %v437_v18  ;;  %v452_v40 = vsub.f32 %v444_v31, %v440_v29 }
  0x36   : > { %v461_v41 = vmin.f32 %v433_v17, %v444_v31  ;;  %v471_v42 = vmax.f32 %v430_v20, %v441_v30  ;;  %v474_v45 = vmax.f32 %v433_v17, %v444_v31  ;;  %v475_v46 = vmin.f32 %v429_v16, %v440_v29 }
  0x37   : > { %v399_v27 = vsel %vm398_vm1, %v397_v19, 0.0  ;;  %v410_v28 = vrot.slane %v397_v19, 2  ;;  %v915_v43 = vpop.eup %914  ;;  %v459_v44 = vsub.f32 %v457_v36, %v458_v25  ;;  %v450_v49 = vmul.f32 %v448_v33, %v445_v32 }
  0x38   : > { %400 = vadd.xlane.f32.xlu0 %v399_v27  ;;  %v531_v48 = vmul.f32 1.4142, %v915_v43  ;;  %v454_v50 = vrot.slane %v452_v40, 1  ;;  %v463_v51 = vsub.f32 %v461_v41, %v462_v37  ;;  %v473_v54 = vsub.f32 %v471_v42, %v472_v34 }
  0x39   : > { %v413_v35 = vsel %vm412_vm2, %v410_v28, 0.0  ;;  %v460_v53 = vmax.f32 %v459_v44, 0.0  ;;  %v476_v55 = vsub.f32 %v474_v45, %v475_v46  ;;  %v246_v56 = vperm.slane %v242_v26, 0  ;;  %v1278_v45 = vld [vmem:[%s1468_s4 + $0x8] sm:$0xf] }
  0x3a   : > { %414 = vadd.xlane.f32.xlu1 %v413_v35  ;;  %v535_v57 = vmul.f32 %v533_v22, %v531_v48  ;;  %v456_v58 = vmul.f32 %v454_v50, %v451_v39  ;;  %v464_v59 = vmax.f32 %v463_v51, 0.0  ;;  %v247_v60 = vperm.slane %v245_v38, 0 }
  0x3b   : > { %v1208_v61 = vshrl.u32 %v243_v0, 7  ;;  %v478_v62 = vrot.slane %v476_v55, 1  ;;  %v254_v63 = vand.u32 2147483647, %v1203_v47  ;;  %v255_v1 = vand.u32 2147483647, %v1205_v52 }
  0x3c   : > { %v536_v4 = vadd.f32 %v535_v57, %v1163_v2  ;;  %vm394_vm3 = vcmp.gt.f32.partialorder %v1182_v15, 0.0  ;;  %v466_v5 = vrot.slane %v464_v59, 1  ;;  %v469_v6 = vadd.f32 %v456_v58, %v450_v49 }
  0x3d   : > { %v480_v7 = vmul.f32 %v478_v62, %v473_v54  ;;  %v256_v8 = vsub.f32 0.0, %v254_v63  ;;  %v257_v9 = vsub.f32 0.0, %v255_v1  ;;  %vm248_vm4 = vcmp.eq.s32.totalorder %v1208_v61, %v246_v56 }
  0x3e   : > { %v537_v10 = vmul.f32 %v1182_v15, %v536_v4  ;;  %v1215_v11 = vmul.f32 %v466_v5, %v460_v53  ;;  %vm249_vm5 = vcmp.eq.s32.totalorder %v1208_v61, %v247_v60  ;;  %vm517_vm6 = vcmask 1040384   ;;  %v1316_v4 = vld [vmem:[%s1154_s18 + $0x8] sm:$0xff] }
  0x3f   : > { %v1221_v0 = vsel %vm394_vm3, %v480_v7, 1.0  ;;  %v258_v2 = vmul.f32 1.442695, %v256_v8  ;;  %v260_v12 = vmul.f32 1.442695, %v257_v9  ;;  %v1226_v17 = vsel %vm248_vm4, 1.0, %v1038_v14 }
  0x40   : > { %v539_v13 = vrot.slane %v537_v10, 7  ;;  %v470_v16 = vsub.f32 %v469_v6, %v1215_v11  ;;  %916 = vrcp.f32 %v1221_v0  ;;  %v1229_v18 = vsel %vm249_vm5, 1.0, %v1038_v14 }
  0x41   : > { %918 = vpow2.f32 %v258_v2  ;;  %v300_v21 = vmax.f32 %v1203_v47, 0.0  ;;  %v508_v22 = vand.u32 2147483647, %v1221_v0  ;;  %v510_v23 = vand.u32 2147483648, %v1221_v0 }
  0x42   : > { %v541_v19 = vsel %vm517_vm6, %v539_v13, 0.0  ;;  %v1234_v20 = vsel %vm394_vm3, %v470_v16, 1.0  ;;  %920 = vpow2.f32 %v260_v12  ;;  %v302_v24 = vmul.f32 %v1226_v17, %v1203_v47 }
  0x43   : > { %542 = vadd.xlane.f32.xlu2 %v541_v19  ;;  %922 = vrcp.f32 %v1234_v20  ;;  %v492_v25 = vand.u32 2147483647, %v1234_v20  ;;  %v494_v26 = vand.u32 2147483648, %v1234_v20  ;;  %v301_v27 = vmax.f32 %v1205_v52, 0.0 }
  0x44   : > { %v303_v28 = vmul.f32 %v1229_v18, %v1205_v52  ;;  %vm488_vm7 = vweird.f32 %v1234_v20  ;;  %v498_v30 = vsub.f32 %v1221_v0, %v1234_v20  ;;  %vm504_vm8 = vweird.f32 %v1221_v0 }
  0x45   : > { %vm1254_vm9 = vcmp.eq.f32.partialorder %v508_v22, 8.507059e+37  ;;  %v511_v34 = vor.u32 1.1754944e-38, %v510_v23  ;;  %v1258_v35 = vsub.f32 %v300_v21, %v302_v24  ;;  %vm1262_vm10 = vcmp.eq.f32.partialorder %v492_v25, 8.507059e+37 }
  0x46   : > { %v917_v29 = vpop.eup %916  ;;  %v495_v38 = vor.u32 1.1754944e-38, %v494_v26  ;;  %v1269_v40 = vsub.f32 %v301_v27, %v303_v28  ;;  %v316_v44 = vsub.f32 1.0, %v1226_v17  ;;  %v317_v48 = vsub.f32 1.0, %v1229_v18  ;;  %v1341_v28 = vld [vmem:[%s1154_s18 + $0x10] sm:$0xff] }
  0x47   : > { %v1251_v31 = vpop.eup %918  ;;  %v500_v32 = vmul.f32 %v917_v29, %v1221_v0  ;;  %vm505_vm11 = vweird.f32 %v917_v29  ;;  %v1284_v49 = vmul.f32 0.25, %v1226_v17  ;;  %vm579_vm12 = vcmask 1047555  }
  0x48   : > { %v1260_v36 = vpop.eup %920  ;;  %v1267_v39 = vadd.f32 1.0, %v1251_v31  ;;  %v552_v51 = vrot.slane %v1168_v3, 7  ;;  %v553_v53 = vrot.slane %v1278_v45, 7  ;;  %vm1292_vm14 = vmor %vm504_vm8, %vm505_vm11  ;;  %v1297_v56 = vmul.f32 0.25, %v1229_v18 }
  0x49   : > { %v923_v41 = vpop.eup %922  ;;  %v501_v42 = vsub.f32 1.0, %v500_v32  ;;  %v1272_v43 = vadd.f32 1.0, %v1260_v36  ;;  %vm853_vm15 = vcmp.lt.s32.totalorder %v1278_v45, 0  ;;  %vm559_vm3 = vcmask 1042432  }
  0x4a   : > { %v484_v46 = vmul.f32 %v923_v41, %v1234_v20  ;;  %924 = vrcp.f32 %v1267_v39  ;;  %vm489_vm13 = vweird.f32 %v923_v41  ;;  %vm269_vm0 = vweird.f32 %v1267_v39 }
  0x4b   : > { %v502_v50 = vmul.f32 %v917_v29, %v501_v42  ;;  %926 = vrcp.f32 %v1272_v43  ;;  %v273_v3 = vand.u32 2147483647, %v1267_v39  ;;  %v275_v58 = vand.u32 2147483648, %v1267_v39  ;;  %vm1308_vm5 = vmor %vm488_vm7, %vm489_vm13 }
  0x4c   : > { %v485_v54 = vsub.f32 1.0, %v484_v46  ;;  %vm284_vm4 = vweird.f32 %v1272_v43  ;;  %v288_v60 = vand.u32 2147483647, %v1272_v43  ;;  %v290_v62 = vand.u32 2147483648, %v1272_v43 }
  0x4d   : > { %v503_v57 = vadd.f32 %v917_v29, %v502_v50  ;;  %928 = vlog2.f32 %v1267_v39  ;;  %v554_v5 = vsel %vm517_vm6, %v552_v51, %v553_v53  ;;  %v854_v6 = vceil.f32 %v1278_v45 }
  0x4e   : > { %v486_v59 = vmul.f32 %v923_v41, %v485_v54  ;;  %v556_v10 = vsub.f32 %v1316_v4, %v554_v5  ;;  %v855_v0 = vfloor.f32 %v1278_v45  ;;  %vm1325_vm7 = vcmp.eq.f32.partialorder %v273_v3, 8.507059e+37 }
  0x4f   : > { %v507_v1 = vsel %vm1292_vm14, %v917_v29, %v503_v57  ;;  %v276_v16 = vor.u32 1.1754944e-38, %v275_v58  ;;  %930 = vlog2.f32 %v1272_v43  ;;  %vm294_vm8 = vcmp.ge.f32.partialorder %v1203_v47, 0.0 }
  0x50   : > { %v925_v7 = vpop.eup %924  ;;  %v487_v8 = vadd.f32 %v923_v41, %v486_v59  ;;  %v512_v9 = vsel %vm1254_vm9, %v511_v34, %v507_v1  ;;  %v557_v22 = vand.u32 2147483647, %v556_v10  ;;  %vm295_vm11 = vcmp.ge.f32.partialorder %v1205_v52, 0.0 }
  0x51   : > { %v927_v2 = vpop.eup %926  ;;  %v265_v12 = vmul.f32 %v925_v7, %v1267_v39  ;;  %v513_v20 = vmul.f32 %v512_v9, %v498_v30  ;;  %vm270_vm9 = vweird.f32 %v925_v7  ;;  %v856_v25 = vsel %vm853_vm15, %v854_v6, %v855_v0 }
  0x52   : > { %v491_v19 = vsel %vm1308_vm5, %v923_v41, %v487_v8  ;;  %v280_v21 = vmul.f32 %v927_v2, %v1272_v43  ;;  %vm285_vm13 = vweird.f32 %v927_v2  ;;  %v558_v29 = vmul.f32 %v1182_v15, %v557_v22  ;;  %vm1348_vm14 = vmor %vm269_vm0, %vm270_vm9 }
  0x53   : > { %v496_v23 = vsel %vm1262_vm10, %v495_v38, %v491_v19  ;;  %v266_v24 = vsub.f32 1.0, %v265_v12  ;;  %v929_v30 = vpop.eup %928  ;;  %v857_v33 = vcvt.f32.s32 %v856_v25  ;;  %v580_v34 = vsel %vm579_vm12, %v1316_v4, -inf  ;;  %vm1357_vm15 = vmor %vm284_vm4, %vm285_vm13 }
  0x54   : > { %v497_v26 = vmul.f32 %v496_v23, %v1215_v11  ;;  %v281_v27 = vsub.f32 1.0, %v280_v21  ;;  %vm581_vm10 = vcmask 1046528   ;;  %v560_v41 = vsel %vm559_vm3, %v558_v29, 0.0  ;;  %v385_v23 = vld [vmem:[%s1154_s18 + $0x20] sm:$0x7] }
  0x55   : > { %v267_v32 = vmul.f32 %v925_v7, %v266_v24  ;;  %v571_v42 = vadd.s32 8, %v1208_v61  ;;  %v931_v46 = vpop.eup %930  ;;  %v291_v53 = vor.u32 1.1754944e-38, %v290_v62  ;;  %v572_v39 = vperm.slane %v857_v33, 2  ;;  %561 = vadd.xlane.f32.xlu2 %v560_v41 }
  0x56   : > { %v514_v37 = vsub.f32 %v497_v26, %v513_v20  ;;  %v282_v11 = vmul.f32 %v927_v2, %v281_v27  ;;  %v582_v54 = vsel %vm581_vm10, %v1341_v28, -inf  ;;  %vm289_vm12 = vcmp.eq.f32.partialorder %v288_v60, 8.507059e+37  ;;  %v384_v27 = vld [vmem:[%s1154_s18 + $0x18] sm:$0xff] }
  0x57   : > { %v268_v50 = vadd.f32 %v925_v7, %v267_v32  ;;  %v583_v3 = vmax.f32 %v580_v34, %v582_v54  ;;  %v324_v43 = vmul.f32 0.75, %v316_v44  ;;  %v325_v59 = vmul.f32 0.75, %v317_v48 }
  0x58   : > { %v515_v55 = vsub.f32 1.0, %v514_v37  ;;  %v283_v57 = vadd.f32 %v927_v2, %v282_v11  ;;  %vm573_vm0 = vcmp.eq.s32.totalorder %v1208_v61, %v572_v39  ;;  %vm574_vm4 = vcmp.eq.s32.totalorder %v571_v42, %v572_v39 }
  0x59   : > { %v272_v58 = vsel %vm1348_vm14, %v925_v7, %v268_v50  ;;  %v829_v6 = vsel %vm573_vm0, 1.0, %v1038_v14  ;;  %v584_v7 = vrot.slane %v583_v3, 4  ;;  %v307_v9 = vmul.f32 0.6931472, %v929_v30 }
  0x5a   : > { %v516_v62 = vmul.f32 %v1182_v15, %v515_v55  ;;  %v277_v63 = vsel %vm1325_vm7, %v276_v16, %v272_v58  ;;  %v287_v60 = vsel %vm1357_vm15, %v927_v2, %v283_v57  ;;  %v309_v10 = vmul.f32 0.6931472, %v931_v46 }
  0x5b   : > { %v292_v1 = vsel %vm289_vm12, %v291_v53, %v287_v60  ;;  %v296_v5 = vmul.f32 %v1251_v31, %v277_v63  ;;  %v326_v2 = vadd.f32 %v324_v43, %v1284_v49  ;;  %v830_v12 = vsel %vm574_vm4, 1.0, %v1038_v14 }
  0x5c   : > { %v518_v8 = vsel %vm517_vm6, %v516_v62, 0.0  ;;  %v297_v61 = vmul.f32 %v1260_v36, %v292_v1  ;;  %v585_v31 = vmax.f32 %v583_v3, %v584_v7  ;;  %v639_v20 = vrot.slane %v829_v6, 1 }
  0x5d   : > { %519 = vadd.xlane.f32.xlu1 %v518_v8  ;;  %v298_v0 = vsel %vm294_vm8, %v277_v63, %v296_v5  ;;  %v327_v22 = vadd.f32 %v325_v59, %v1297_v56  ;;  %v310_v25 = vadd.f32 %v307_v9, %v1258_v35  ;;  %v311_v49 = vadd.f32 %v309_v10, %v1269_v40 }
  0x5e   : > { %v299_v13 = vsel %vm295_vm11, %v292_v1, %v297_v61  ;;  %v312_v16 = vmul.f32 %v1226_v17, %v298_v0  ;;  %v314_v19 = vsub.f32 1.0, %v298_v0  ;;  %v586_v24 = vrot.slane %v585_v31, 2 }
  0x5f   : > { %v313_v36 = vmul.f32 %v1229_v18, %v299_v13  ;;  %v315_v21 = vsub.f32 1.0, %v299_v13  ;;  %v640_v29 = vrot.slane %v830_v12, 1  ;;  %v617_v33 = vrot.slane %v829_v6, 5 }
  0x60   : > { %v318_v26 = vmul.f32 %v316_v44, %v314_v19  ;;  %v587_v32 = vmax.f32 %v585_v31, %v586_v24  ;;  %v618_v34 = vrot.slane %v830_v12, 5  ;;  %v645_v38 = vmul.f32 %v639_v20, %v1341_v28 }
  0x61   : > { %v319_v30 = vmul.f32 %v317_v48, %v315_v21  ;;  %v641_v56 = vsel %vm581_vm10, %v639_v20, %v640_v29  ;;  %v647_v11 = vmul.f32 %v640_v29, %v385_v23  ;;  %v328_v42 = vmul.f32 %v326_v2, %v310_v25 }
  0x62   : > { %v320_v37 = vadd.f32 %v318_v26, %v312_v16  ;;  %v588_v41 = vrot.slane %v587_v32, 1  ;;  %v646_v40 = vmul.f32 %v641_v56, %v384_v27  ;;  %v329_v17 = vmul.f32 %v327_v22, %v311_v49 }
  0x63   : > { %v321_v35 = vadd.f32 %v319_v30, %v313_v36  ;;  %v654_v46 = vrot.slane %v647_v11, 7  ;;  %v619_v18 = vsel %vm559_vm3, %v617_v33, %v618_v34  ;;  %v651_v39 = vrot.slane %v645_v38, 7 }
  0x64   : > { %v330_v44 = vsub.f32 1.0, %v320_v37  ;;  %v1398_v51 = vmax.f32 %v587_v32, %v588_v41  ;;  %v652_v48 = vrot.slane %v646_v40, 7  ;;  %vm336_vm5 = vcmask 124928  }
  0x65   : > { %v331_v50 = vsub.f32 1.0, %v321_v35  ;;  %v622_v58 = vmul.f32 %v617_v33, %v1316_v4  ;;  %v623_v43 = vmul.f32 %v619_v18, %v1341_v28  ;;  %vm598_vm7 = vcmask 1044480  }
  0x66   : > { %v332_v53 = vmul.f32 %v330_v44, %v330_v44  ;;  %v590_v55 = vsub.f32 %v1316_v4, %v1398_v51  ;;  %v591_v57 = vsub.f32 %v1341_v28, %v1398_v51  ;;  %v655_v59 = vsel %vm517_vm6, %v652_v48, %v654_v46 }
  0x67   : > { %v333_v54 = vmul.f32 %v331_v50, %v331_v50  ;;  %v653_v5 = vsel %vm517_vm6, %v651_v39, %v652_v48  ;;  %v658_v6 = vsel %vm412_vm2, %v655_v59, 0.0  ;;  %v626_v61 = vrot.slane %v622_v58, 3 }
  0x68   : > { %v334_v3 = vmul.f32 %v332_v53, %v328_v42  ;;  %v592_v63 = vmul.f32 1.442695, %v590_v55  ;;  %v594_v60 = vmul.f32 1.442695, %v591_v57  ;;  %v627_v9 = vrot.slane %v623_v43, 3 }
  0x69   : > { %v335_v62 = vmul.f32 %v333_v54, %v329_v17  ;;  %v659_v10 = vadd.f32 %v658_v6, %v653_v5  ;;  %vm349_vm8 = vcmask 123904   ;;  %vm373_vm13 = vcmask 1043459  }
  0x6a   : > { %v337_v1 = vsel %vm336_vm5, %v334_v3, 0.0  ;;  %932 = vpow2.f32 %v592_v63  ;;  %v628_v4 = vsel %vm598_vm7, %v626_v61, %v627_v9  ;;  %v631_v28 = vsel %vm412_vm2, %v627_v9, 0.0 }
  0x6b   : > { %v338_v7 = vsel %vm336_vm5, %v335_v62, 0.0  ;;  %934 = vpow2.f32 %v594_v60  ;;  %v660_v2 = vrot.slane %v659_v10, 4  ;;  %v632_v16 = vadd.f32 %v631_v28, %v628_v4 }
  0x6c   : > { %v339_v8 = vadd.f32 %v338_v7, %v337_v1  ;;  %v350_v25 = vsel %vm349_vm8, %v1203_v47, -inf  ;;  %v357_v49 = vsel %vm349_vm8, %v1205_v52, -inf  ;;  %vm376_vm14 = vcmask 125954  }
  0x6d   : > { %v661_v36 = vadd.f32 %v660_v2, %v659_v10  ;;  %v633_v22 = vrot.slane %v632_v16, 4  ;;  %v351_v27 = vrot.slane %v350_v25, 4  ;;  %v358_v29 = vrot.slane %v357_v49, 4 }
  0x6e   : > { %340 = vadd.xlane.f32.xlu0 %v339_v8  ;;  %vm699_vm15 = vcmask 1045504  }
  0x6f   : > { %v662_v24 = vrot.slane %v661_v36, 2  ;;  %v634_v30 = vadd.f32 %v633_v22, %v632_v16  ;;  %v352_v33 = vmax.f32 %v350_v25, %v351_v27  ;;  %v359_v34 = vmax.f32 %v357_v49, %v358_v29 }
  0x70   : > { %v933_v0 = vpop.eup %932 }
  0x71   : > { %v935_v12 = vpop.eup %934  ;;  %v599_v31 = vrot.slane %v933_v0, 3  ;;  %v663_v37 = vadd.f32 %v662_v24, %v661_v36  ;;  %v353_v38 = vrot.slane %v352_v33, 2  ;;  %v360_v11 = vrot.slane %v359_v34, 2 }
  0x72   : > { %v600_v13 = vrot.slane %v935_v12, 3  ;;  %v635_v35 = vrot.slane %v634_v30, 2 }
  0x73   : > { %v354_v40 = vmax.f32 %v352_v33, %v353_v38  ;;  %v361_v42 = vmax.f32 %v359_v34, %v360_v11  ;;  %v664_v17 = vrot.slane %v663_v37, 1 }
  0x74   : > { %v601_v19 = vsel %vm598_vm7, %v599_v31, %v600_v13  ;;  %v604_v20 = vsel %vm412_vm2, %v600_v13, 0.0  ;;  %v636_v18 = vadd.f32 %v635_v35, %v634_v30 }
  0x75   : > { %v605_v21 = vadd.f32 %v604_v20, %v601_v19  ;;  %v355_v46 = vrot.slane %v354_v40, 1  ;;  %v362_v50 = vrot.slane %v361_v42, 1  ;;  %v665_v39 = vadd.f32 %v664_v17, %v663_v37 }
  0x76   : > { %v637_v54 = vrot.slane %v636_v18, 1 }
  0x77   : > { %v606_v23 = vrot.slane %v605_v21, 4  ;;  %v356_v48 = vmax.f32 %v354_v40, %v355_v46  ;;  %v363_v53 = vmax.f32 %v361_v42, %v362_v50  ;;  %v666_v58 = vsub.f32 %v665_v39, %v1278_v45 }
  0x78   : > { %v638_v63 = vadd.f32 %v637_v54, %v636_v18  ;;  %v1039_v50 = vmov 0  }
  0x79   : > { %v607_v26 = vadd.f32 %v606_v23, %v605_v21  ;;  %vm364_vm9 = vcmp.ge.f32.partialorder %v356_v48, %v1203_v47  ;;  %vm365_vm11 = vcmp.ge.f32.partialorder %v363_v53, %v1205_v52  ;;  %v667_v1 = vand.u32 2147483647, %v666_v58  ;;  %913 = vset.pattern.permute.xlu0 %v1039_v50  ;;  %912 = vset.pattern.permute.xlu2 %v1039_v50 }
  0x7a   : > { %v826_v55 = vsel %vm364_vm9, 1.0, %v1038_v14  ;;  %v827_v57 = vsel %vm365_vm11, 1.0, %v1038_v14 }
  0x7b   : > { %v608_v32 = vrot.slane %v607_v26, 2  ;;  %v372_v3 = vrot.slane %v827_v57, 7 }
  0x7d   : > { %v609_v56 = vadd.f32 %v608_v32, %v607_v26  ;;  %v374_v59 = vsel %vm373_vm13, %v372_v3, %v826_v55 }
  0x7e   : > { %v377_v60 = vsel %vm376_vm14, %v374_v59, 0.0 }
  0x7f   : > { %v610_v41 = vrot.slane %v609_v56, 1  ;;  %378 = vadd.xlane.f32.xlu1 %v377_v60 }
  0x81   : > { %v611_v44 = vadd.f32 %v610_v41, %v609_v56 }
  0x83   : > { %936 = vlog2.f32 %v611_v44 }
  0x89   : > { %v937_v43 = vpop.eup %936 }
  0x8a   : > { %v613_v62 = vmul.f32 0.6931472, %v937_v43 }
  0x8c   : > { %v614_v47 = vadd.f32 %v613_v62, %v1398_v51 }
  0x8e   : > { %v668_v52 = vsub.f32 %v614_v47, %v638_v63 }
  0x90   : > { %v669_v5 = vadd.f32 %v668_v52, %v667_v1 }
  0x92   : > { %v670_v6 = vmul.f32 %v1182_v15, %v669_v5 }
  0x94   : > { %v672_v7 = vrot.slane %v670_v6, 3 }
  0x96   : > { %v674_v14 = vsel %vm517_vm6, %v672_v7, 0.0 }
  0x97   : > { %675 = vadd.xlane.f32.xlu0 %v674_v14 }
  0xab   : > { %v401_v45 = vpop.xlane.xlu0 %400 }
  0xac   : > { %v402_v10 = vrot.slane %v401_v45, 4 }
  0xad   : > { %v415_v8 = vpop.xlane.xlu1 %414 }
  0xae   : > { %v416_v28 = vrot.slane %v415_v8, 4  ;;  %v403_v12 = vadd.f32 %v402_v10, %v401_v45 }
  0xb0   : > { %v417_v13 = vadd.f32 %v416_v28, %v415_v8  ;;  %v404_v19 = vrot.slane %v403_v12, 2 }
  0xb2   : > { %v418_v21 = vrot.slane %v417_v13, 2  ;;  %v405_v49 = vadd.f32 %v404_v19, %v403_v12 }
  0xb4   : > { %v419_v29 = vadd.f32 %v418_v21, %v417_v13  ;;  %v406_v33 = vrot.slane %v405_v49, 1 }
  0xb6   : > { %v543_v61 = vpop.xlane.xlu2 %542  ;;  %v420_v38 = vrot.slane %v419_v29, 1  ;;  %v407_v40 = vadd.f32 %v406_v33, %v405_v49 }
  0xb7   : > { %v544_v2 = vrot.slane %v543_v61, 4 }
  0xb8   : > { %v421_v17 = vadd.f32 %v420_v38, %v419_v29 }
  0xb9   : > { %v545_v16 = vadd.f32 %v544_v2, %v543_v61 }
  0xbb   : > { %v546_v23 = vrot.slane %v545_v16, 2 }
  0xbd   : > { %v547_v32 = vadd.f32 %v546_v23, %v545_v16 }
  0xbf   : > { %v548_v41 = vrot.slane %v547_v32, 1 }
  0xc1   : > { %v549_v46 = vadd.f32 %v548_v41, %v547_v32 }
  0xc8   : > { %v562_v0 = vpop.xlane.xlu2 %561 }
  0xc9   : > { %v563_v31 = vrot.slane %v562_v0, 4 }
  0xcb   : > { %v564_v36 = vadd.f32 %v563_v31, %v562_v0 }
  0xcd   : > { %v565_v25 = vrot.slane %v564_v36, 2 }
  0xcf   : > { %v566_v37 = vadd.f32 %v565_v25, %v564_v36 }
  0xd0   : > { %v520_v9 = vpop.xlane.xlu1 %519 }
  0xd1   : > { %v521_v4 = vrot.slane %v520_v9, 4  ;;  %v567_v11 = vrot.slane %v566_v37, 1 }
  0xd3   : > { %v522_v51 = vadd.f32 %v521_v4, %v520_v9  ;;  %v568_v44 = vadd.f32 %v567_v11, %v566_v37 }
  0xd5   : > { %v523_v15 = vrot.slane %v522_v51, 2 }
  0xd7   : > { %v524_v26 = vadd.f32 %v523_v15, %v522_v51 }
  0xd9   : > { %v525_v34 = vrot.slane %v524_v26, 1 }
  0xdb   : > { %v526_v42 = vadd.f32 %v525_v34, %v524_v26 }
  0xe1   : > { %v341_v20 = vpop.xlane.xlu0 %340 }
  0xe2   : > { %v342_v22 = vrot.slane %v341_v20, 4 }
  0xe4   : > { %v343_v24 = vadd.f32 %v342_v22, %v341_v20 }
  0xe6   : > { %v344_v27 = vrot.slane %v343_v24, 2 }
  0xe8   : > { %v345_v30 = vadd.f32 %v344_v27, %v343_v24 }
  0xea   : > { %v346_v56 = vrot.slane %v345_v30, 1 }
  0xec   : > { %v347_v35 = vadd.f32 %v346_v56, %v345_v30 }
  0xee   : > { %841 = vpush %v347_v35 }
  0xef   : > { %843 = vpush %v407_v40 }
  0xf0   : > { %845 = vpush %v421_v17 }
  0xf1   : > { %847 = vpush %v526_v42 }
  0xf2   : > { %849 = vpush %v549_v46  ;;  %v379_v18 = vpop.xlane.xlu1 %378 }
  0xf3   : > { %851 = vpush %v568_v44  ;;  %v692_v48 = vrot.slane %v379_v18, 3 }
  0xf5   : > { %v702_v53 = vsel %vm517_vm6, %v692_v48, 0.0 }
  0xf6   : > { %710 = vperm.xlu0 %913, %v702_v53  }
 0x10a   : > { %v676_v39 = vpop.xlane.xlu0 %675 }
 0x10b   : > { %v677_v54 = vrot.slane %v676_v39, 4 }
 0x10d   : > { %v678_v55 = vadd.f32 %v677_v54, %v676_v39 }
 0x10f   : > { %v679_v57 = vrot.slane %v678_v55, 2 }
 0x111   : > { %v680_v3 = vadd.f32 %v679_v57, %v678_v55 }
 0x113   : > { %v681_v58 = vrot.slane %v680_v3, 1 }
 0x115   : > { %v682_v43 = vadd.f32 %v681_v58, %v680_v3 }
 0x117   : > { %858 = vpush %v682_v43 }
 0x11f   : > { %s842_s9 = spop %841 }
 0x120   : > { %s844_s12 = spop %843  ;;  %v684_v59 = vstv %s842_s9  ;;  %s982_s9 = sshra.s32 %s731_s10, 4  ;;  %s983_s9 = int_to_ptr.hbm [resolvable:$true] %s982_s9 }
 0x121   : > { %v685_v62 = vstv %s844_s12  ;;  %s846_s15 = spop %845  ;;  %s984_s12 = scalar_lea.hbm %s983_s9, 16 }
 0x122   : > { %v694_v63 = vsel %vm517_vm6, %v684_v59, %v685_v62  ;;  %v686_v60 = vstv %s846_s15  ;;  %s848_s18 = spop %847  ;;  %p985_p6 = scmp.ne.s32.totalorder %s983_s9, %s984_s12 }
 0x123   : > { %v695_v47 = vsel %vm398_vm1, %v694_v63, %v686_v60  ;;  %v687_v1 = vstv %s848_s18  ;;  %s850_s13 = spop %849  ;;  %s988_s18 = scalar_lea.hbm %s1469_s5, 48 }
 0x124   : > { %v696_v52 = vsel %vm559_vm3, %v695_v47, %v687_v1  ;;  %s852_s14 = spop %851  ;;  %v688_v5 = vstv %s850_s13  ;;  %p986_p0 = pnand %p985_p6, %p1120_p10 }
 0x125   : > { %v697_v6 = vsel %vm412_vm2, %v696_v52, %v688_v5  ;;  %v689_v7 = vstv %s852_s14  ;;  %p989_p2 = scmp.lt.s32.totalorder %s983_s9, %s1469_s5  ;;  %p990_p3 = scmp.lt.s32.totalorder %s988_s18, %s984_s12 }
 0x126   : > { %v698_v14 = vsel %vm598_vm7, %v697_v6, %v689_v7  ;;  %p987_p1 = pneg %p986_p0 }
 0x127   : > { %p991_p4 = por %p990_p3, %p989_p2 }
 0x129   : > { %p992_p5 = pnand %p991_p4, %p987_p1 }
 0x148   : > { %s859_s16 = spop %858 }
 0x149   : > { %v690_v8 = vstv %s859_s16 }
 0x14a   : > { %v700_v61 = vsel %vm699_vm15, %v698_v14, %v690_v8 }
 0x14b   : > { %v701_v45 = vsel %vm581_vm10, %v700_v61, %v692_v48 }
 0x14c   : > { %705 = vperm.xlu2 %912, %v701_v45  }
 0x168   : > { %v711_v9 = vpop.permute.xlu0 %710 }
 0x169   : > { %714 = vst [vmem:[%s234_s17 + $0x8] sm:$0xff] %v711_v9 }
 0x1a6   : > { %v706_v10 = vpop.permute.xlu2 %705 }
 0x1a7   : > { %713 = vst [vmem:[%s234_s17] sm:$0xff] %v706_v10 }
 0x1a8   : > { %995 = shalt.err (!%p992_p5)
}
 0x1a9   : > { %s1040_s11 = smov 128   ;;  %s1041_s16 = smov 8  }
 0x1aa   : > { %862 = dma.vmem_to_hbm [thread:$0]  (%p1120_p10), %s729_s8, 256, %s731_s10, %s716_s7, %s1040_s11, %s1040_s11, %s1041_s16  }
 0x1ab PF: > { %p873_p7 = scmp.ge.s32.totalorder %s1034_s23, 2  ;;  %s745_s29 = sand.u32 1, %s1022_s20  }
 0x1ac   : > { %s746_s17 = scalar_lea.sflag [#allocation6], %s745_s29 }
 0x1ad   : > { %p869_p8 = pnand %p873_p7, %p1124_p11 }
 0x1af   : > { %p870_p9 = pneg %p869_p8 }
 0x1b1   : > { %1017 = dma.done.wait (%p870_p9), %s746_s17, 256  }
 0x1b2   : > { %1019 = vsyncadd (%p870_p9), %s746_s17, 4294967040  ;;  %p19_p13 = scmp.ge.s32.totalorder %s1100_s25, 5   ;;  %s1488_s20 = smov %s1026_s21 }
 0x1b3   : > { %s1489_s21 = smov %s1030_s22  ;;  %s1490_s22 = smov %s1112_s28 }
 0x1b4   : > { %s1491_s23 = smov %s1100_s25  ;;  %21 = sbr.rel (!%p19_p13) target bundleno = 7 (0x7), region = 84 }
 0x1b9   :  { %752 = vsyncpa [#allocation5], 1 }
 0x1ba   :  { %754 = vsyncpa [#allocation5 + $0x1], 1 }
 0x1bb   :  { %755 = vsyncpa [#allocation6], 1 }
 0x1bc   :  { %757 = vsyncpa [#allocation6 + $0x1], 1 }

</bundles_post_ra>
